<compile_context>
chip_gen: v7x
topology: tpu7x:2x2x1
jax: 0.10.0
libtpu: 0.0.40
codegen_flags: <defaults>
</compile_context>

<pallas_src>
import functools
import math

import jax
import jax.numpy as jnp
from jax.experimental import pallas as pl
from jax.experimental.pallas import tpu as pltpu


_MIB = 1024 * 1024


def _round_up(x, m):
    return (x + m - 1) // m * m


def _hw_budgets():
    """Generation-aware budgets: (vmem_limit_bytes, per-block target, #TCs)."""
    vmem_cap = 64 * _MIB          # conservative default (v7x-sized VMEM)
    num_tc = 1
    try:
        info = pltpu.get_tpu_info()
        vmem_cap = int(getattr(info, "vmem_capacity_bytes", vmem_cap))
        # Heuristic: 64 MiB parts (v7x) have 2 TensorCores per chip.
        num_tc = 2 if vmem_cap <= 64 * _MIB else 1
        for attr in ("num_tensorcores", "tensorcore_count", "num_cores"):
            v = getattr(info, attr, None)
            if isinstance(v, int) and v > 0:
                num_tc = v
                break
    except Exception:
        pass
    # Leave headroom for double-buffered in+out blocks and Mosaic scratch
    # (~80% of physical VMEM, never the full 64 MiB on v7x).
    vmem_limit = min(int(0.8 * vmem_cap), 100 * _MIB)
    # Per-block target: ~12.5 MiB on 128 MiB parts, ~6 MiB on 64 MiB parts.
    block_target = max(2 * _MIB, min(16 * _MIB, vmem_limit // 8))
    return vmem_limit, block_target, num_tc


def _padded_block_bytes(block, itemsize):
    """Approximate VMEM footprint of a block incl. (sublane, lane) tile padding."""
    block = tuple(block)
    if len(block) == 0:
        return itemsize
    if len(block) == 1:
        block = (1,) + block
    sub_tile = max(8, 32 // itemsize)   # 8 for f32, 16 for bf16, 32 for int8
    lead = math.prod(block[:-2])
    sub = _round_up(block[-2], sub_tile)
    lane = _round_up(block[-1], 128)
    return lead * sub * lane * itemsize


def _merge_adjacent_axes(shape, perm):
    """Merge runs of input axes that stay adjacent and in order in the output.

    Standard transpose rank reduction; the implied wrapper-side reshapes are
    contiguous (free).  Returns (reduced_shape, reduced_perm).
    """
    n = len(perm)
    inv = [0] * n
    for j, a in enumerate(perm):
        inv[a] = j
    groups = [[0]]
    for a in range(1, n):
        if inv[a] == inv[a - 1] + 1:
            groups[-1].append(a)
        else:
            groups.append([a])
    red_shape = tuple(math.prod(shape[a] for a in g) for g in groups)
    order = sorted(range(len(groups)), key=lambda gi: inv[groups[gi][0]])
    return red_shape, tuple(order)


# ----------------------------------------------------------------------------
# Kernels
# ----------------------------------------------------------------------------

def _copy_kernel(x_ref, o_ref):
    # Pure DMA relayout: the permutation lives in the BlockSpec index_maps.
    o_ref[...] = x_ref[...]


def _transpose_kernel(perm, x_ref, o_ref):
    # Small in-VMEM transpose of one block (after rank reduction this is
    # typically a batched 2-D transpose of the trailing dims).
    o_ref[...] = jnp.transpose(x_ref[...], perm)


def _transpose_fused_kernel(perm, x_ref, o_ref):
    # Transpose the block, then collapse the trailing two output dims so the
    # store is lane-dense (last dim a multiple of 128 / full) instead of
    # masked vst on a narrow lane dim.
    # TODO(synk): if XLU becomes the binding slot on v7x, a pltpu.einshape
    # based lowering of this swap+collapse may be cheaper.
    t = jnp.transpose(x_ref[...], perm)
    o_ref[...] = t.reshape(o_ref.shape)


# ----------------------------------------------------------------------------
# Pure-DMA path: a trailing run of axes is fixed; only leading axes move.
# ----------------------------------------------------------------------------

def _permute_leading_axes(x, perm, vmem_limit, block_target):
    n = x.ndim
    shape = x.shape
    itemsize = x.dtype.itemsize
    out_shape_full = tuple(shape[a] for a in perm)

    # Maximal fixed suffix (caller guarantees >= 2 axes).
    k = 0
    for j in range(n - 1, -1, -1):
        if perm[j] == j:
            k += 1
        else:
            break
    m = n - k                          # number of moving leading axes (>= 2)
    sub = shape[m]
    lane = math.prod(shape[m + 1:])    # k >= 2, so this is >= shape[n-1]
    lead_in = shape[:m]
    lead_perm = perm[:m]               # a permutation of range(m)
    out_lead = tuple(shape[a] for a in lead_perm)
    inv = [0] * m
    for j, a in enumerate(lead_perm):
        inv[a] = j

    xr = x.reshape(lead_in + (sub, lane))   # contiguous (free) reshape

    # Budget-derived trailing tile: full dims or 8/128-aligned.
    sub_unit = max(8, 32 // itemsize)
    st, lt = sub, lane

    def fits(st_, lt_):
        return _padded_block_bytes((st_, lt_), itemsize) <= block_target

    while not fits(st, lt):
        if lt > 128 and _round_up(lt, 128) >= _round_up(st, sub_unit):
            lt = max(128, ((lt // 2) // 128) * 128)
        elif st > sub_unit:
            st = max(sub_unit, ((st // 2) // sub_unit) * sub_unit)
        elif lt > 128:
            lt = max(128, ((lt // 2) // 128) * 128)
        else:
            break

    grid = out_lead + (pl.cdiv(sub, st), pl.cdiv(lane, lt))
    block = (1,) * m + (st, lt)

    def out_map(*g):
        return tuple(g[:m]) + (g[m], g[m + 1])

    def in_map(*g):
        # Permute the leading block indices; trailing tile indices pass through.
        return tuple(g[inv[a]] for a in range(m)) + (g[m], g[m + 1])

    # TODO(synk): pipeline_mode=pl.Buffered(3) on the input spec can hide DMA
    # issue latency for small strided source blocks; left at default depth.
    out = pl.pallas_call(
        _copy_kernel,
        out_shape=jax.ShapeDtypeStruct(out_lead + (sub, lane), x.dtype),
        grid=grid,
        in_specs=[pl.BlockSpec(block, in_map)],
        out_specs=pl.BlockSpec(block, out_map),
        compiler_params=pltpu.CompilerParams(
            dimension_semantics=("parallel",) * len(grid),
            vmem_limit_bytes=vmem_limit),
        cost_estimate=pl.CostEstimate(
            flops=0, transcendentals=0,
            bytes_accessed=2 * x.size * itemsize),
    )(xr)
    return out.reshape(out_shape_full)   # contiguous (free) reshape


# ----------------------------------------------------------------------------
# General path: the last axis moves -> blocked in-VMEM transpose.
# ----------------------------------------------------------------------------

def _general_call(xr, red_perm, vmem_limit, block_target, num_tc, fuse_last):
    red_shape = xr.shape
    n = len(red_perm)
    inv = [0] * n
    for j, a in enumerate(red_perm):
        inv[a] = j
    oshape = tuple(red_shape[a] for a in red_perm)
    itemsize = xr.dtype.itemsize

    # Output axes that must live inside the block so the trailing two dims of
    # BOTH the input and output blocks are full (or 8/128-aligned tiles).
    f_out = {j for j in range(n) if j >= n - 2 or red_perm[j] >= n - 2}
    gridded = [j for j in range(n) if j not in f_out]

    def out_blocks(tile_axis, tile):
        ob = []
        for j in range(n):
            if j in gridded:
                ob.append(1)
            elif tile_axis is not None and j == tile_axis:
                ob.append(tile)
            else:
                ob.append(oshape[j])
        ib = tuple(ob[inv[a]] for a in range(n))
        ob = tuple(ob)
        fob = ob[:-2] + (ob[-2] * ob[-1],) if fuse_last else ob
        return ib, ob, fob

    def worst_bytes(ib, fob):
        return max(_padded_block_bytes(ib, itemsize),
                   _padded_block_bytes(fob, itemsize))

    in_block, out_ub, out_block = out_blocks(None, None)
    block_bytes = worst_bytes(in_block, out_block)
    grid_size = math.prod([oshape[j] for j in gridded]) if gridded else 1

    # Tile one in-block output axis: (a) keep blocks inside the per-generation
    # VMEM budget; (b) guarantee >= num_tc parallel programs on multi-TC parts
    # (v7x).  On single-TC parts (v5e/v6e) the grid is a serial loop, so never
    # split just for parallelism there.
    need_core_split = num_tc >= 2 and grid_size < num_tc
    tile_axis, tile = None, None
    if block_bytes > block_target or need_core_split:
        cands = []
        for j in sorted(f_out):
            if j == n - 1:
                continue                 # output lane dim: last resort only
            if fuse_last and j == n - 2:
                base = 128               # keeps fused last block dim 128-aligned
            elif red_perm[j] == n - 1:
                base = 128               # this output dim is the input lane dim
            else:
                base = 8
            if oshape[j] >= 2 * base:
                cands.append((oshape[j], j, base))
        if not cands and not fuse_last and oshape[n - 1] >= 2 * 128:
            # Escape hatch: tile the output lane dim in 128-multiples (stores
            # stay unmasked) instead of blowing past VMEM on big trailing dims.
            cands.append((oshape[n - 1], n - 1, 128))
        if cands:
            _, j, base = max(cands)
            t = (oshape[j] // base) * base
            while t > base:
                ib_t, _, fob_t = out_blocks(j, t)
                if worst_bytes(ib_t, fob_t) <= block_target:
                    break
                t = max(base, ((t // 2) // base) * base)
            if need_core_split and t >= oshape[j]:
                t = max(base, ((oshape[j] // 2) // base) * base)
            tile_axis, tile = j, t
            in_block, out_ub, out_block = out_blocks(tile_axis, tile)
        # TODO(synk): oversized slabs with no 8/128-tileable axis would need a
        # manual-DMA / emit_pipeline sub-tiling fallback; rely on vmem_limit.

    grid = tuple(oshape[j] for j in gridded)
    if tile_axis is not None:
        grid = grid + (pl.cdiv(oshape[tile_axis], tile),)
    dummy_grid = len(grid) == 0
    if dummy_grid:
        grid = (1,)

    def out_idx(*g):
        idx = [0] * n
        if not dummy_grid:
            for gi, j in enumerate(gridded):
                idx[j] = g[gi]
            if tile_axis is not None:
                idx[tile_axis] = g[len(gridded)]
        return idx

    def in_map(*g):
        oi = out_idx(*g)
        return tuple(oi[inv[a]] for a in range(n))

    if fuse_last:
        out_arr_shape = oshape[:-2] + (oshape[-2] * oshape[-1],)

        def out_map(*g):
            oi = out_idx(*g)
            return tuple(oi[:-2]) + (oi[-2],)

        kernel = functools.partial(_transpose_fused_kernel, red_perm)
    else:
        out_arr_shape = oshape

        def out_map(*g):
            return tuple(out_idx(*g))

        kernel = functools.partial(_transpose_kernel, red_perm)

    out = pl.pallas_call(
        kernel,
        out_shape=jax.ShapeDtypeStruct(out_arr_shape, xr.dtype),
        grid=grid,
        in_specs=[pl.BlockSpec(in_block, in_map)],
        out_specs=pl.BlockSpec(out_block, out_map),
        compiler_params=pltpu.CompilerParams(
            dimension_semantics=("parallel",) * len(grid),
            vmem_limit_bytes=vmem_limit),
        cost_estimate=pl.CostEstimate(
            flops=0, transcendentals=0,
            bytes_accessed=2 * xr.size * itemsize),
    )(xr)
    if fuse_last:
        out = out.reshape(oshape)        # contiguous (free) reshape
    return out


def _permute_general(x, perm, vmem_limit, block_target, num_tc):
    orig_out_shape = tuple(x.shape[a] for a in perm)

    # Rank reduction (free reshapes in the wrapper).
    red_shape, red_perm = _merge_adjacent_axes(x.shape, perm)
    if red_perm == tuple(range(len(red_perm))):
        return x.reshape(orig_out_shape)   # data order unchanged -> pure reshape
    xr = x.reshape(red_shape)
    oshape = tuple(red_shape[a] for a in red_perm)

    # Lane-dense output: when the (reduced) output last dim is narrow (<128),
    # fuse the trailing two output dims so stores are unmasked full-lane vst
    # instead of vst.msk on a narrow lane dim (worst on v5e's single vst slot).
    # The in-kernel collapse-reshape lowering is shape dependent in Mosaic, so
    # fall back to the plain non-fused kernel on any failure.
    if len(red_perm) >= 2 and oshape[-1] < 128 and oshape[-2] * oshape[-1] >= 128:
        try:
            out = _general_call(xr, red_perm, vmem_limit, block_target, num_tc,
                                fuse_last=True)
            jax.block_until_ready(out)   # surface lowering/runtime errors here
            return out.reshape(orig_out_shape)
        except Exception:
            pass

    out = _general_call(xr, red_perm, vmem_limit, block_target, num_tc,
                        fuse_last=False)
    return out.reshape(orig_out_shape)     # contiguous (free) reshape


# ----------------------------------------------------------------------------
# Public API
# ----------------------------------------------------------------------------

def pallas_permute(x, perm):
    """Pallas equivalent of torch.Tensor.permute(*perm)."""
    n = x.ndim
    perm = tuple((int(p) + n) % n for p in perm) if n > 0 else tuple(perm)
    assert sorted(perm) == list(range(n)), "perm must be a permutation of the axes"

    if n < 2 or perm == tuple(range(n)):
        # Identity permutation (or rank < 2): permute is a pure view.
        return x

    vmem_limit, block_target, num_tc = _hw_budgets()
    if perm[-2] == n - 2 and perm[-1] == n - 1:
        return _permute_leading_axes(x, perm, vmem_limit, block_target)
    return _permute_general(x, perm, vmem_limit, block_target, num_tc)


class Permute:
    """Mirrors the PyTorch nn.Module: Permute(*args)(x) == x.permute(*args)."""

    def __init__(self, *args):
        self.args = args

    def __call__(self, x):
        return pallas_permute(x, self.args)


if __name__ == "__main__":
    key = jax.random.PRNGKey(0)
    x = jax.random.normal(key, (2, 4, 16, 16), dtype=jnp.float32)  # NCHW

    # Main check: NCHW -> NHWC (last axis moves -> general path, lane-dense
    # fused-output store when the Mosaic reshape lowers; safe fallback otherwise).
    perm = (0, 2, 3, 1)
    out = jax.block_until_ready(Permute(*perm)(x))
    ref = jnp.transpose(x, perm)
    assert out.shape == ref.shape, (out.shape, ref.shape)
    assert out.dtype == ref.dtype, (out.dtype, ref.dtype)
    assert jnp.array_equal(out, ref), "Pallas permute mismatch (NCHW->NHWC)"

    # Also exercise the pure-DMA path (trailing axes untouched).
    perm2 = (1, 0, 2, 3)
    out2 = jax.block_until_ready(Permute(*perm2)(x))
    ref2 = jnp.transpose(x, perm2)
    assert out2.shape == ref2.shape and jnp.array_equal(out2, ref2), \
        "Pallas permute mismatch (batch/channel swap)"

    print("KERNEL_OK")
</pallas_src>

<mosaic_0001>
module attributes {stable_mosaic.version = 11 : i64} {
  func.func @_transpose_kernel(%arg0: i32, %arg1: memref<1x4x256xf32, #tpu.memory_space<vmem>>, %arg2: memref<1x256x4xf32, #tpu.memory_space<vmem>>) attributes {dimension_semantics = [#tpu.dimension_semantics<parallel>], iteration_bounds = array<i64: 2>, scalar_prefetch = 0 : i64, scratch_operands = 0 : i64, tpu.core_type = #tpu.core_type<tc>, window_params = [{transform_indices = @transform_0, window_bounds = array<i64: 1, 4, 256>}, {transform_indices = @transform_1, window_bounds = array<i64: 1, 256, 4>}]} {
    %c0 = arith.constant 0 : index
    %c0_0 = arith.constant 0 : index
    %c0_1 = arith.constant 0 : index
    %0 = vector.load %arg1[%c0, %c0_0, %c0_1] : memref<1x4x256xf32, #tpu.memory_space<vmem>>, vector<1x4x256xf32>
    %1 = tpu.transpose %0, [0, 2, 1] : vector<1x4x256xf32> -> vector<1x256x4xf32>
    %c0_2 = arith.constant 0 : index
    %c0_3 = arith.constant 0 : index
    %c0_4 = arith.constant 0 : index
    %2 = vector.load %arg2[%c0_2, %c0_3, %c0_4] : memref<1x256x4xf32, #tpu.memory_space<vmem>>, vector<1x256x4xf32>
    tpu.vector_store %arg2[%c0_2, %c0_3, %c0_4], %1 {strides = array<i32>} : memref<1x256x4xf32, #tpu.memory_space<vmem>>, vector<1x256x4xf32>,
    return
  }
  func.func @transform_0(%arg0: i32) -> (i32, i32, i32) {
    %c0_i32 = arith.constant 0 : i32
    %c0_i32_0 = arith.constant 0 : i32
    %c0_i32_1 = arith.constant 0 : i32
    return %arg0, %c0_i32, %c0_i32_0 : i32, i32, i32
  }
  func.func @transform_1(%arg0: i32) -> (i32, i32, i32) {
    %c0_i32 = arith.constant 0 : i32
    %c0_i32_0 = arith.constant 0 : i32
    %c0_i32_1 = arith.constant 0 : i32
    return %arg0, %c0_i32, %c0_i32_0 : i32, i32, i32
  }
}

</mosaic_0001>

<bundles_post_ra>
// kernel: tpu_custom_call.1
= control target key start
LH: loop header
LB: loop body
LE: loop exit
PB: predicated region body
PF: predicated region fallthrough
CT: control target
= control target key end

     0   :  { %6 = vsyncpa [#allocation3], 0  ;;  %s608_s0 = inlined_call_operand.hbm [shape: f32[2,4,256], index: 0, kind: input, shape index: {}]   ;;  %s609_s1 = inlined_call_operand.vmem [shape: f32[2,256,4], index: 1, kind: output, shape index: {}]  }
   0x1   :  { %8 = vsyncpa [#allocation3 + $0x1], 0  ;;  %s435_s6 = smov 0   ;;  %s437_s7 = smov 0  }
   0x2   :  { %s439_s8 = smov 0   ;;  %s441_s9 = smov 0  }
   0x3 LB: > { %s454_s10 = sadd.s32 4294967295, %s422_s9   ;;  %s457_s11 = sadd.s32 1, %s422_s9   ;;  %s422_s9 = sphi %s441_s9, %s617_s9   ;;  %s418_s8 = sphi %s439_s8, %s616_s8   ;;  %s414_s7 = sphi %s437_s7, %s615_s7   ;;  %s410_s6 = sphi %s435_s6, %s614_s6  }
   0x4   : > { %s18_s12 = ssub.s32 %s422_s9, %s457_s11  ;;  %s21_s13 = sadd.s32 1, %s418_s8 }
   0x5   : > { %p19_p0 = scmp.eq.s32.totalorder %s18_s12, 0  ;;  %p28_p1 = scmp.ne.s32.totalorder %s418_s8, %s414_s7 }
   0x6   : > { %p29_p2 = scmp.eq.s32.totalorder %s422_s9, 0  ;;  %p34_p3 = scmp.ne.s32.totalorder %s414_s7, %s410_s6 }
   0x7   : > { %s467_s14 = scalar_select %p19_p0, %s418_s8, %s21_s13  }
   0x8   : > { %p30_p4 = por %p29_p2, %p28_p1  ;;  %p35_p5 = scmp.eq.s32.totalorder %s454_s10, 0 }
   0x9   : > { %p323_p6 = scmp.lt.s32.totalorder %s422_s9, 2  ;;  %s84_s16 = sand.u32 1, %s418_s8  }
   0xa   : > { %p471_p7 = por %p35_p5, %p34_p3  ;;  %s306_s17 = sshll.u32 %s84_s16, 3 }
   0xb   : > { %s315_s18 = sshll.u32 %s422_s9, 7  ;;  %s88_s22 = scalar_lea.vmem [#allocation2], %s306_s17 }
   0xc   : > { %s480_s21 = scalar_lea.hbm %s608_s0, %s315_s18  ;;  %s96_s23 = sshll.u32 %s88_s22, 4  ;;  %s482_s23 = int_to_ptr.vmem [resolvable:$true] %s96_s23 }
   0xd   : > { %p484_p8 = pnand %p323_p6, %p30_p4  ;;  %s85_s25 = scalar_lea.sflag [#allocation3], %s84_s16 }
   0xe   : > { %s358_s26 = scalar_lea.hbm %s480_s21, 128  ;;  %s363_s29 = scalar_lea.hbm %s608_s0, 256 }
   0xf   : > { %p359_p11 = scmp.ne.s32.totalorder %s480_s21, %s358_s26  ;;  %p360_p12 = pneg %p484_p8 }
  0x10   : > { %p364_p1 = scmp.lt.u32.totalorder %s480_s21, %s608_s0  ;;  %p365_p2 = scmp.lt.u32.totalorder %s363_s29, %s358_s26 }
  0x11   : > { %p361_p13 = pnand %p360_p12, %p359_p11  ;;  %p367_p4 = scmp.lt.u32.totalorder %s358_s26, %s480_s21 }
  0x12   : > { %p366_p3 = por %p365_p2, %p364_p1 }
  0x13   : > { %p362_p0 = pneg %p361_p13 }
  0x14   : > { %p368_p5 = por %p367_p4, %p366_p3 }
  0x16   : > { %p369_p6 = pnand %p368_p5, %p362_p0 }
  0x18   : > { %372 = shalt.err (!%p369_p6)
}
  0x19   : > { %s373_s3 = scalar_lea.vmem %s482_s23, 128  ;;  %s424_s4 = smov [#allocation2]  }
  0x1a   : > { %p374_p11 = scmp.ne.s32.totalorder %s482_s23, %s373_s3  ;;  %s378_s5 = sshll.u32 %s424_s4, 4  ;;  %s379_s5 = int_to_ptr.vmem [resolvable:$false] %s378_s5 }
  0x1b   : > { %s380_s6 = scalar_lea.vmem %s379_s5, 256  ;;  %p381_p10 = scmp.lt.s32.totalorder %s482_s23, %s379_s5 }
  0x1c   : > { %p376_p13 = pnand %p374_p11, %p360_p12  ;;  %p382_p1 = scmp.lt.s32.totalorder %s380_s6, %s373_s3 }
  0x1e   : > { %p377_p9 = pneg %p376_p13  ;;  %p383_p2 = por %p382_p1, %p381_p10 }
  0x20   : > { %p384_p3 = pnand %p383_p2, %p377_p9 }
  0x22   : > { %387 = shalt.err (!%p384_p3)
}
  0x23   : > { %322 = dma.hbm_to_vmem [thread:$0]  (!%p484_p8), %s480_s21, 128, %s482_s23, %s85_s25  }
  0x24   : > { %p612_p0 = scmp.lt.s32.totalorder %s422_s9, 3  ;;  %p613_p4 = scmp.ge.s32.totalorder %s422_s9, 1 }
  0x26   : > { %p102_p12 = pnand %p613_p4, %p612_p0 }
  0x27   : > { %s107_s12 = sand.u32 (!%p102_p12), 1, %s414_s7  }
  0x28   : > { %105 = sbr.rel (%p102_p12) target bundleno = 303 (0x12f), region = 24  ;;  %s310_s13 = sshll.u32 (!%p102_p12), %s107_s12, 3 }
  0x29   : > { %s108_s16 = scalar_lea.sflag (!%p102_p12), [#allocation3], %s107_s12  ;;  %s111_s17 = scalar_lea.vmem (!%p102_p12), [#allocation2], %s310_s13 }
  0x2f   : > { %405 = dma.done.wait (%p471_p7), %s108_s16, 128  }
  0x30   : > { %407 = vsyncadd (%p471_p7), %s108_s16, 4294967168  ;;  %v135_v0 = vld [vmem:[%s111_s17] sm:$0xff]  ;;  %p130_p8 = scmp.lt.s32.totalorder %s454_s10, 1  ;;  %vm203_vm0 = vcmask 31744  }
  0x31   : > { %139 = vxpose.xlu0.b32.start.end [1/1] (short) %v135_v0, 128  ;;  %v137_v1 = vcombine.high %v135_v0, %v135_v0 }
  0x32   : > { %s619_s10 = smov (!%p130_p8, %s454_s10), 1 }
  0x33   : > { %s316_s9 = sshll.u32 %s619_s10, 8 }
  0x34   : > { %s529_s20 = scalar_lea.vmem %s609_s1, %s316_s9 }
  0x6e   : > { %171 = vxpose.xlu0.b32.start.end [1/1] (short) %v137_v1, 128 }
  0xb1   : > { %v155_v2 = vpop.trf.xlu0 }
  0xb2   : > { %204 = vst.msk [vmem:[%s529_s20] sm:$0xff] %vm203_vm0, %v155_v2 }
  0xb5   : > { %v156_v3 = vpop.trf.xlu0 }
  0xb6   : > { %205 = vst.msk [vmem:[%s529_s20 + $0x8] sm:$0xff] %vm203_vm0, %v156_v3 }
  0xb9   : > { %v157_v4 = vpop.trf.xlu0 }
  0xba   : > { %206 = vst.msk [vmem:[%s529_s20 + $0x10] sm:$0xff] %vm203_vm0, %v157_v4 }
  0xbd   : > { %v158_v5 = vpop.trf.xlu0 }
  0xbe   : > { %207 = vst.msk [vmem:[%s529_s20 + $0x18] sm:$0xff] %vm203_vm0, %v158_v5 }
  0xc1   : > { %v159_v6 = vpop.trf.xlu0 }
  0xc2   : > { %208 = vst.msk [vmem:[%s529_s20 + $0x20] sm:$0xff] %vm203_vm0, %v159_v6 }
  0xc5   : > { %v160_v7 = vpop.trf.xlu0 }
  0xc6   : > { %209 = vst.msk [vmem:[%s529_s20 + $0x28] sm:$0xff] %vm203_vm0, %v160_v7 }
  0xc9   : > { %v161_v8 = vpop.trf.xlu0 }
  0xca   : > { %210 = vst.msk [vmem:[%s529_s20 + $0x30] sm:$0xff] %vm203_vm0, %v161_v8 }
  0xcd   : > { %v162_v9 = vpop.trf.xlu0 }
  0xce   : > { %211 = vst.msk [vmem:[%s529_s20 + $0x38] sm:$0xff] %vm203_vm0, %v162_v9 }
  0xd1   : > { %v163_v10 = vpop.trf.xlu0 }
  0xd2   : > { %212 = vst.msk [vmem:[%s529_s20 + $0x40] sm:$0xff] %vm203_vm0, %v163_v10 }
  0xd5   : > { %v164_v11 = vpop.trf.xlu0 }
  0xd6   : > { %213 = vst.msk [vmem:[%s529_s20 + $0x48] sm:$0xff] %vm203_vm0, %v164_v11 }
  0xd9   : > { %v165_v12 = vpop.trf.xlu0 }
  0xda   : > { %214 = vst.msk [vmem:[%s529_s20 + $0x50] sm:$0xff] %vm203_vm0, %v165_v12 }
  0xdd   : > { %v166_v13 = vpop.trf.xlu0 }
  0xde   : > { %215 = vst.msk [vmem:[%s529_s20 + $0x58] sm:$0xff] %vm203_vm0, %v166_v13 }
  0xe1   : > { %v167_v14 = vpop.trf.xlu0 }
  0xe2   : > { %216 = vst.msk [vmem:[%s529_s20 + $0x60] sm:$0xff] %vm203_vm0, %v167_v14 }
  0xe5   : > { %v168_v15 = vpop.trf.xlu0 }
  0xe6   : > { %217 = vst.msk [vmem:[%s529_s20 + $0x68] sm:$0xff] %vm203_vm0, %v168_v15 }
  0xe9   : > { %v169_v16 = vpop.trf.xlu0 }
  0xea   : > { %218 = vst.msk [vmem:[%s529_s20 + $0x70] sm:$0xff] %vm203_vm0, %v169_v16 }
  0xed   : > { %v170_v17 = vpop.trf.xlu0 }
  0xee   : > { %219 = vst.msk [vmem:[%s529_s20 + $0x78] sm:$0xff] %vm203_vm0, %v170_v17 }
  0xf1   : > { %v187_v18 = vpop.trf.xlu0 }
  0xf2   : > { %220 = vst.msk [vmem:[%s529_s20 + $0x80] sm:$0xff] %vm203_vm0, %v187_v18 }
  0xf5   : > { %v188_v19 = vpop.trf.xlu0 }
  0xf6   : > { %221 = vst.msk [vmem:[%s529_s20 + $0x88] sm:$0xff] %vm203_vm0, %v188_v19 }
  0xf9   : > { %v189_v20 = vpop.trf.xlu0 }
  0xfa   : > { %222 = vst.msk [vmem:[%s529_s20 + $0x90] sm:$0xff] %vm203_vm0, %v189_v20 }
  0xfd   : > { %v190_v21 = vpop.trf.xlu0 }
  0xfe   : > { %223 = vst.msk [vmem:[%s529_s20 + $0x98] sm:$0xff] %vm203_vm0, %v190_v21 }
 0x101   : > { %v191_v22 = vpop.trf.xlu0 }
 0x102   : > { %224 = vst.msk [vmem:[%s529_s20 + $0xa0] sm:$0xff] %vm203_vm0, %v191_v22 }
 0x105   : > { %v192_v23 = vpop.trf.xlu0 }
 0x106   : > { %225 = vst.msk [vmem:[%s529_s20 + $0xa8] sm:$0xff] %vm203_vm0, %v192_v23 }
 0x109   : > { %v193_v24 = vpop.trf.xlu0 }
 0x10a   : > { %226 = vst.msk [vmem:[%s529_s20 + $0xb0] sm:$0xff] %vm203_vm0, %v193_v24 }
 0x10d   : > { %v194_v25 = vpop.trf.xlu0 }
 0x10e   : > { %227 = vst.msk [vmem:[%s529_s20 + $0xb8] sm:$0xff] %vm203_vm0, %v194_v25 }
 0x111   : > { %v195_v26 = vpop.trf.xlu0 }
 0x112   : > { %228 = vst.msk [vmem:[%s529_s20 + $0xc0] sm:$0xff] %vm203_vm0, %v195_v26 }
 0x115   : > { %v196_v27 = vpop.trf.xlu0 }
 0x116   : > { %229 = vst.msk [vmem:[%s529_s20 + $0xc8] sm:$0xff] %vm203_vm0, %v196_v27 }
 0x119   : > { %v197_v28 = vpop.trf.xlu0 }
 0x11a   : > { %230 = vst.msk [vmem:[%s529_s20 + $0xd0] sm:$0xff] %vm203_vm0, %v197_v28 }
 0x11d   : > { %v198_v29 = vpop.trf.xlu0 }
 0x11e   : > { %231 = vst.msk [vmem:[%s529_s20 + $0xd8] sm:$0xff] %vm203_vm0, %v198_v29 }
 0x121   : > { %v199_v30 = vpop.trf.xlu0 }
 0x122   : > { %232 = vst.msk [vmem:[%s529_s20 + $0xe0] sm:$0xff] %vm203_vm0, %v199_v30 }
 0x125   : > { %v200_v31 = vpop.trf.xlu0 }
 0x126   : > { %233 = vst.msk [vmem:[%s529_s20 + $0xe8] sm:$0xff] %vm203_vm0, %v200_v31 }
 0x129   : > { %v201_v32 = vpop.trf.xlu0 }
 0x12a   : > { %234 = vst.msk [vmem:[%s529_s20 + $0xf0] sm:$0xff] %vm203_vm0, %v201_v32 }
 0x12d   : > { %v202_v33 = vpop.trf.xlu0 }
 0x12e   : > { %235 = vst.msk [vmem:[%s529_s20 + $0xf8] sm:$0xff] %vm203_vm0, %v202_v33 }
 0x12f PF: > { %p11_p7 = scmp.ge.s32.totalorder %s457_s11, 4   ;;  %s614_s6 = smov %s414_s7 }
 0x130   : > { %s615_s7 = smov %s418_s8  ;;  %s616_s8 = smov %s467_s14 }
 0x131   : > { %s617_s9 = smov %s457_s11  ;;  %13 = sbr.rel (!%p11_p7) target bundleno = 3 (0x3), region = 64 }
 0x138   :  { %257 = vsyncpa [#allocation3], 1 }
 0x139   :  { %259 = vsyncpa [#allocation3 + $0x1], 1 }

</bundles_post_ra>
